<compile_context>
chip_gen: v5e
topology: v5e:2x2
jax: 0.10.0
libtpu: 0.0.40
codegen_flags: <defaults>
</compile_context>

<pallas_src>
import math

import jax
import jax.numpy as jnp
from jax.experimental import pallas as pl
from jax.experimental.pallas import tpu as pltpu


def bit_estimator_kernel(x_ref, sph_ref, b_ref, ta_ref, o_ref):
    # x_ref: (tm, Cp)   sph_ref/b_ref: (4, Cp)   ta_ref: (3, Cp)
    x = x_ref[...].astype(jnp.float32)
    sp_h = sph_ref[...]      # softplus(h), precomputed in the wrapper
    b = b_ref[...]
    ta = ta_ref[...]         # tanh(a), precomputed in the wrapper

    # Layers 1..3 (non-final Bitparm)
    for i in range(3):
        x = x * sp_h[i:i + 1, :] + b[i:i + 1, :]
        x = x + jnp.tanh(x) * ta[i:i + 1, :]

    # Final Bitparm
    x = x * sp_h[3:4, :] + b[3:4, :]
    o_ref[...] = jax.nn.sigmoid(x).astype(o_ref.dtype)


def _round_up(v, m):
    return ((v + m - 1) // m) * m


def bit_estimator(x, h, b, a, *, tm=None):
    """x: (..., C).  h, b: (4, C).  a: (3, C)."""
    orig_shape = x.shape
    orig_dtype = x.dtype
    C = x.shape[-1]
    M = x.size // C

    # --- Hoist grid-invariant parameter transcendentals out of the kernel ---
    sp_h = jax.nn.softplus(h.astype(jnp.float32))    # (4, C)
    b_f32 = b.astype(jnp.float32)                    # (4, C)
    tanh_a = jnp.tanh(a.astype(jnp.float32))         # (3, C)

    # --- Lane-dense channel packing: make the last dim a multiple of 128 ---
    G = math.lcm(C, 128) // C          # smallest G with G*C % 128 == 0
    if G * C > 2048:                   # keep packed row width modest
        G = 1
    Cp = G * C

    rows0 = -(-M // G)                 # packed rows before tile padding

    # --- Pick a row tile: ~2 MiB blocks, multiple of 8 rows, capped at 2048 ---
    if tm is None:
        target_block_bytes = 2 << 20
        n_blocks = max(2, -(-(rows0 * Cp * 4) // target_block_bytes))
        tm = min(2048, max(8, _round_up(-(-rows0 // n_blocks), 8)))
    else:
        tm = max(8, _round_up(tm, 8))

    # --- Pad rows of (M, C) so the packed row count divides the tile ---
    x2 = x.reshape(M, C)
    pad_to = G * tm
    M_pad = _round_up(M, pad_to)
    if M_pad != M:
        x2 = jnp.pad(x2, ((0, M_pad - M), (0, 0)))
    rows = M_pad // G
    x3 = x2.reshape(rows, Cp)

    if G > 1:
        sp_h_p = jnp.tile(sp_h, (1, G))      # column j -> channel j % C,
        b_p = jnp.tile(b_f32, (1, G))        # matching the packed x layout
        ta_p = jnp.tile(tanh_a, (1, G))
    else:
        sp_h_p, b_p, ta_p = sp_h, b_f32, tanh_a

    grid = rows // tm
    out = pl.pallas_call(
        bit_estimator_kernel,
        out_shape=jax.ShapeDtypeStruct((rows, Cp), orig_dtype),
        grid_spec=pltpu.PrefetchScalarGridSpec(
            num_scalar_prefetch=0,
            grid=(grid,),
            in_specs=[
                pl.BlockSpec((tm, Cp), lambda i: (i, 0)),   # x rows tile
                pl.BlockSpec((4, Cp), lambda i: (0, 0)),    # softplus(h)
                pl.BlockSpec((4, Cp), lambda i: (0, 0)),    # b
                pl.BlockSpec((3, Cp), lambda i: (0, 0)),    # tanh(a)
            ],
            out_specs=pl.BlockSpec((tm, Cp), lambda i: (i, 0)),
        ),
        compiler_params=pltpu.CompilerParams(
            dimension_semantics=("parallel",)),
    )(x3, sp_h_p, b_p, ta_p)

    out = out.reshape(M_pad, C)[:M]
    return out.reshape(orig_shape)


def init_params(key, channel):
    """Deterministic synthetic init matching torch.nn.init.normal_(std=0.01)."""
    kh, kb, ka = jax.random.split(key, 3)
    h = 0.01 * jax.random.normal(kh, (4, channel), dtype=jnp.float32)
    b = 0.01 * jax.random.normal(kb, (4, channel), dtype=jnp.float32)
    a = 0.01 * jax.random.normal(ka, (3, channel), dtype=jnp.float32)
    return h, b, a


def bit_estimator_ref(x, h, b, a):
    """Pure-JAX reference of the PyTorch forward."""
    x = x.astype(jnp.float32)
    for i in range(3):
        xi = x * jax.nn.softplus(h[i]) + b[i]
        x = xi + jnp.tanh(xi) * jnp.tanh(a[i])
    return jax.nn.sigmoid(x * jax.nn.softplus(h[3]) + b[3])


if __name__ == "__main__":
    key = jax.random.PRNGKey(0)
    kx, kp = jax.random.split(key)

    channel = 32
    batch, seq = 2, 8
    # x: (batch, seq, channel) -- channel-last so (1, C) params broadcast as in torch
    x = jax.random.normal(kx, (batch, seq, channel), dtype=jnp.float32)
    h, b, a = init_params(kp, channel)

    out = bit_estimator(x, h, b, a)
    out = jax.block_until_ready(out)

    ref = bit_estimator_ref(x, h, b, a)
    assert out.shape == x.shape
    assert jnp.allclose(out, ref, atol=1e-5, rtol=1e-5)

    print("KERNEL_OK")
</pallas_src>

<mosaic_0001>
module attributes {stable_mosaic.version = 11 : i64} {
  func.func @bit_estimator_kernel(%arg0: i32, %arg1: memref<8x128xf32, #tpu.memory_space<vmem>>, %arg2: memref<4x128xf32, #tpu.memory_space<vmem>>, %arg3: memref<4x128xf32, #tpu.memory_space<vmem>>, %arg4: memref<3x128xf32, #tpu.memory_space<vmem>>, %arg5: memref<8x128xf32, #tpu.memory_space<vmem>>) attributes {dimension_semantics = [#tpu.dimension_semantics<parallel>], iteration_bounds = array<i64: 1>, scalar_prefetch = 0 : i64, scratch_operands = 0 : i64, tpu.core_type = #tpu.core_type<tc>, window_params = [{transform_indices = @transform_0, window_bounds = array<i64: 8, 128>}, {pipeline_mode = #tpu.pipeline_mode<synchronous>, transform_indices = @transform_1, window_bounds = array<i64: 4, 128>}, {pipeline_mode = #tpu.pipeline_mode<synchronous>, transform_indices = @transform_2, window_bounds = array<i64: 4, 128>}, {pipeline_mode = #tpu.pipeline_mode<synchronous>, transform_indices = @transform_3, window_bounds = array<i64: 3, 128>}, {transform_indices = @transform_4, window_bounds = array<i64: 8, 128>}]} {
    %c0 = arith.constant 0 : index
    %c0_0 = arith.constant 0 : index
    %0 = vector.load %arg1[%c0, %c0_0] : memref<8x128xf32, #tpu.memory_space<vmem>>, vector<8x128xf32>
    %c0_1 = arith.constant 0 : index
    %c0_2 = arith.constant 0 : index
    %1 = vector.load %arg2[%c0_1, %c0_2] : memref<4x128xf32, #tpu.memory_space<vmem>>, vector<4x128xf32>
    %c0_3 = arith.constant 0 : index
    %c0_4 = arith.constant 0 : index
    %2 = vector.load %arg3[%c0_3, %c0_4] : memref<4x128xf32, #tpu.memory_space<vmem>>, vector<4x128xf32>
    %c0_5 = arith.constant 0 : index
    %c0_6 = arith.constant 0 : index
    %3 = vector.load %arg4[%c0_5, %c0_6] : memref<3x128xf32, #tpu.memory_space<vmem>>, vector<3x128xf32>
    %4 = vector.extract_strided_slice %1 {offsets = [0, 0], sizes = [1, 128], strides = [1, 1]} : vector<4x128xf32> to vector<1x128xf32>
    %5 = vector.broadcast %4 : vector<1x128xf32> to vector<8x128xf32>
    %6 = arith.mulf %0, %5 : vector<8x128xf32>
    %7 = vector.extract_strided_slice %2 {offsets = [0, 0], sizes = [1, 128], strides = [1, 1]} : vector<4x128xf32> to vector<1x128xf32>
    %8 = vector.broadcast %7 : vector<1x128xf32> to vector<8x128xf32>
    %9 = arith.addf %6, %8 : vector<8x128xf32>
    %10 = math.tanh %9 : vector<8x128xf32>
    %11 = vector.extract_strided_slice %3 {offsets = [0, 0], sizes = [1, 128], strides = [1, 1]} : vector<3x128xf32> to vector<1x128xf32>
    %12 = vector.broadcast %11 : vector<1x128xf32> to vector<8x128xf32>
    %13 = arith.mulf %10, %12 : vector<8x128xf32>
    %14 = arith.addf %9, %13 : vector<8x128xf32>
    %15 = vector.extract_strided_slice %1 {offsets = [1, 0], sizes = [1, 128], strides = [1, 1]} : vector<4x128xf32> to vector<1x128xf32>
    %16 = vector.broadcast %15 : vector<1x128xf32> to vector<8x128xf32>
    %17 = arith.mulf %14, %16 : vector<8x128xf32>
    %18 = vector.extract_strided_slice %2 {offsets = [1, 0], sizes = [1, 128], strides = [1, 1]} : vector<4x128xf32> to vector<1x128xf32>
    %19 = vector.broadcast %18 : vector<1x128xf32> to vector<8x128xf32>
    %20 = arith.addf %17, %19 : vector<8x128xf32>
    %21 = math.tanh %20 : vector<8x128xf32>
    %22 = vector.extract_strided_slice %3 {offsets = [1, 0], sizes = [1, 128], strides = [1, 1]} : vector<3x128xf32> to vector<1x128xf32>
    %23 = vector.broadcast %22 : vector<1x128xf32> to vector<8x128xf32>
    %24 = arith.mulf %21, %23 : vector<8x128xf32>
    %25 = arith.addf %20, %24 : vector<8x128xf32>
    %26 = vector.extract_strided_slice %1 {offsets = [2, 0], sizes = [1, 128], strides = [1, 1]} : vector<4x128xf32> to vector<1x128xf32>
    %27 = vector.broadcast %26 : vector<1x128xf32> to vector<8x128xf32>
    %28 = arith.mulf %25, %27 : vector<8x128xf32>
    %29 = vector.extract_strided_slice %2 {offsets = [2, 0], sizes = [1, 128], strides = [1, 1]} : vector<4x128xf32> to vector<1x128xf32>
    %30 = vector.broadcast %29 : vector<1x128xf32> to vector<8x128xf32>
    %31 = arith.addf %28, %30 : vector<8x128xf32>
    %32 = math.tanh %31 : vector<8x128xf32>
    %33 = vector.extract_strided_slice %3 {offsets = [2, 0], sizes = [1, 128], strides = [1, 1]} : vector<3x128xf32> to vector<1x128xf32>
    %34 = vector.broadcast %33 : vector<1x128xf32> to vector<8x128xf32>
    %35 = arith.mulf %32, %34 : vector<8x128xf32>
    %36 = arith.addf %31, %35 : vector<8x128xf32>
    %37 = vector.extract_strided_slice %1 {offsets = [3, 0], sizes = [1, 128], strides = [1, 1]} : vector<4x128xf32> to vector<1x128xf32>
    %38 = vector.broadcast %37 : vector<1x128xf32> to vector<8x128xf32>
    %39 = arith.mulf %36, %38 : vector<8x128xf32>
    %40 = vector.extract_strided_slice %2 {offsets = [3, 0], sizes = [1, 128], strides = [1, 1]} : vector<4x128xf32> to vector<1x128xf32>
    %41 = vector.broadcast %40 : vector<1x128xf32> to vector<8x128xf32>
    %42 = arith.addf %39, %41 : vector<8x128xf32>
    %43 = arith.negf %42 : vector<8x128xf32>
    %44 = math.exp %43 : vector<8x128xf32>
    %cst = arith.constant 1.000000e+00 : f32
    %45 = vector.broadcast %cst : f32 to vector<8x128xf32>
    %46 = arith.addf %45, %44 : vector<8x128xf32>
    %47 = arith.divf %45, %46 : vector<8x128xf32>
    %c0_7 = arith.constant 0 : index
    %c0_8 = arith.constant 0 : index
    %48 = vector.load %arg5[%c0_7, %c0_8] : memref<8x128xf32, #tpu.memory_space<vmem>>, vector<8x128xf32>
    tpu.vector_store %arg5[%c0_7, %c0_8], %47 {strides = array<i32>} : memref<8x128xf32, #tpu.memory_space<vmem>>, vector<8x128xf32>,
    return
  }
  func.func @transform_0(%arg0: i32) -> (i32, i32) {
    %c0_i32 = arith.constant 0 : i32
    %c0_i32_0 = arith.constant 0 : i32
    return %arg0, %c0_i32 : i32, i32
  }
  func.func @transform_1(%arg0: i32) -> (i32, i32) {
    %c0_i32 = arith.constant 0 : i32
    %c0_i32_0 = arith.constant 0 : i32
    %c0_i32_1 = arith.constant 0 : i32
    return %c0_i32, %c0_i32_0 : i32, i32
  }
  func.func @transform_2(%arg0: i32) -> (i32, i32) {
    %c0_i32 = arith.constant 0 : i32
    %c0_i32_0 = arith.constant 0 : i32
    %c0_i32_1 = arith.constant 0 : i32
    return %c0_i32, %c0_i32_0 : i32, i32
  }
  func.func @transform_3(%arg0: i32) -> (i32, i32) {
    %c0_i32 = arith.constant 0 : i32
    %c0_i32_0 = arith.constant 0 : i32
    %c0_i32_1 = arith.constant 0 : i32
    return %c0_i32, %c0_i32_0 : i32, i32
  }
  func.func @transform_4(%arg0: i32) -> (i32, i32) {
    %c0_i32 = arith.constant 0 : i32
    %c0_i32_0 = arith.constant 0 : i32
    return %arg0, %c0_i32 : i32, i32
  }
}

</mosaic_0001>

<bundles_post_ra>
// kernel: tpu_custom_call.1
= control target key start
LH: loop header
LB: loop body
LE: loop exit
PB: predicated region body
PF: predicated region fallthrough
CT: control target
= control target key end

     0   :  { %9 = vsyncpa [#allocation3], 0  ;;  %s333_s0 = inlined_call_operand.hbm [shape: f32[8,128], index: 0, kind: input, shape index: {}]   ;;  %s334_s1 = inlined_call_operand.hbm [shape: f32[4,128], index: 1, kind: input, shape index: {}]   ;;  %s335_s2 = inlined_call_operand.hbm [shape: f32[4,128], index: 2, kind: input, shape index: {}]   ;;  %s336_s3 = inlined_call_operand.hbm [shape: f32[3,128], index: 3, kind: input, shape index: {}]   ;;  %s337_s4 = inlined_call_operand.hbm [shape: f32[8,128], index: 4, kind: output, shape index: {}]  }
   0x1   :  { %10 = vsyncpa [#allocation6], 0 }
   0x2   :  { %11 = vsyncpa [#allocation9], 0  ;;  %s29_s17 = sshll.u32 %s334_s1, 4  ;;  %s30_s17 = int_to_ptr.hbm [resolvable:$true] %s29_s17 }
   0x3   :  { %12 = vsyncpa [#allocation4], 0  ;;  %s288_s18 = smov [#allocation5]   ;;  %s18_s22 = sshll.u32 %s333_s0, 4  ;;  %s19_s22 = int_to_ptr.hbm [resolvable:$true] %s18_s22 }
   0x4   :  { %s31_s19 = sshll.u32 %s288_s18, 4  ;;  %s289_s23 = smov [#allocation2]   ;;  %s32_s19 = int_to_ptr.vmem [resolvable:$true] %s31_s19 }
   0x5   :  { %34 = dma.hbm_to_vmem [thread:$0]  %s30_s17, 64, %s32_s19, [#allocation6]  }
   0x6   :  { %s20_s24 = sshll.u32 %s289_s23, 4  ;;  %s40_s27 = sshll.u32 %s335_s2, 4  ;;  %s21_s24 = int_to_ptr.vmem [resolvable:$true] %s20_s24  ;;  %s41_s27 = int_to_ptr.hbm [resolvable:$true] %s40_s27 }
   0x7   :  { %23 = dma.hbm_to_vmem [thread:$0]  %s19_s22, 128, %s21_s24, [#allocation3]  }
   0x8   :  { %s51_s29 = sshll.u32 %s336_s3, 4  ;;  %s290_s30 = smov [#allocation7]   ;;  %s52_s29 = int_to_ptr.hbm [resolvable:$true] %s51_s29 }
   0x9   :  { %s42_s5 = sshll.u32 %s290_s30, 4  ;;  %s291_s0 = smov [#allocation8]   ;;  %s43_s5 = int_to_ptr.vmem [resolvable:$true] %s42_s5 }
   0xa   :  { %45 = dma.hbm_to_vmem [thread:$0]  %s41_s27, 64, %s43_s5, [#allocation6]  }
   0xb   :  { %s53_s6 = sshll.u32 %s291_s0, 4  ;;  %s54_s6 = int_to_ptr.vmem [resolvable:$true] %s53_s6 }
   0xc   :  { %56 = dma.hbm_to_vmem [thread:$0]  %s52_s29, 64, %s54_s6, [#allocation9]  }
   0xd   :  { %280 = dma.done.wait [#allocation3], 128  }
   0xe   :  { %281 = vsyncadd [#allocation3], 4294967168 }
   0xf   :  { %282 = dma.done.wait [#allocation6], 128  }
  0x10   :  { %283 = vsyncadd [#allocation6], 4294967168 }
  0x11   :  { %284 = dma.done.wait [#allocation9], 64  }
  0x12   :  { %285 = vsyncadd [#allocation9], 4294967232  ;;  %v73_v0 = vld [vmem:[#allocation2] sm:$0xff]  ;;  %v74_v1 = vld [vmem:[#allocation5] sm:$0xf]  ;;  %s292_s2 = smov [#allocation10]  }
  0x13   :  { %v75_v2 = vld [vmem:[#allocation7] sm:$0xf]  ;;  %v77_v3 = vperm.slane %v74_v1, 0  ;;  %v76_v7 = vld [vmem:[#allocation8] sm:$0x7]  ;;  %v85_v11 = vperm.slane %v74_v1, 1 }
  0x14   :  { %v79_v4 = vperm.slane %v75_v2, 0  ;;  %v82_v8 = vperm.slane %v76_v7, 0  ;;  %v87_v13 = vperm.slane %v75_v2, 1  ;;  %v90_v16 = vperm.slane %v76_v7, 1  ;;  %s130_s3 = sshll.u32 %s292_s2, 4  ;;  %s132_s9 = sshll.u32 %s337_s4, 4  ;;  %s131_s3 = int_to_ptr.vmem [resolvable:$true] %s130_s3  ;;  %s133_s9 = int_to_ptr.hbm [resolvable:$true] %s132_s9 }
  0x15   :  { %v78_v5 = vmul.f32 %v77_v3, %v73_v0  ;;  %v93_v19 = vperm.slane %v74_v1, 2  ;;  %v95_v21 = vperm.slane %v75_v2, 2  ;;  %v98_v24 = vperm.slane %v76_v7, 2 }
  0x16   :  { %v101_v27 = vperm.slane %v74_v1, 3  ;;  %v103_v29 = vperm.slane %v75_v2, 3 }
  0x17   :  { %v80_v6 = vadd.f32 %v79_v4, %v78_v5 }
  0x19   :  { %150 = vtanh.f32 %v80_v6 }
  0x1f   :  { %v151_v9 = vpop.eup %150 }
  0x20   :  { %v83_v10 = vmul.f32 %v151_v9, %v82_v8 }
  0x22   :  { %v84_v12 = vadd.f32 %v83_v10, %v80_v6 }
  0x24   :  { %v86_v14 = vmul.f32 %v85_v11, %v84_v12 }
  0x26   :  { %v88_v15 = vadd.f32 %v87_v13, %v86_v14 }
  0x28   :  { %152 = vtanh.f32 %v88_v15 }
  0x2e   :  { %v153_v17 = vpop.eup %152 }
  0x2f   :  { %v91_v18 = vmul.f32 %v153_v17, %v90_v16 }
  0x31   :  { %v92_v20 = vadd.f32 %v91_v18, %v88_v15 }
  0x33   :  { %v94_v22 = vmul.f32 %v93_v19, %v92_v20 }
  0x35   :  { %v96_v23 = vadd.f32 %v95_v21, %v94_v22 }
  0x37   :  { %154 = vtanh.f32 %v96_v23 }
  0x3d   :  { %v155_v25 = vpop.eup %154 }
  0x3e   :  { %v99_v26 = vmul.f32 %v155_v25, %v98_v24 }
  0x40   :  { %v100_v28 = vadd.f32 %v99_v26, %v96_v23 }
  0x42   :  { %v102_v30 = vmul.f32 %v101_v27, %v100_v28 }
  0x44   :  { %v104_v31 = vadd.f32 %v103_v29, %v102_v30 }
  0x46   :  { %v144_v32 = vmul.f32 -1.442695, %v104_v31 }
  0x48   :  { %156 = vpow2.f32 %v144_v32 }
  0x4e   :  { %v157_v33 = vpop.eup %156 }
  0x4f   :  { %v108_v34 = vadd.f32 1.0, %v157_v33 }
  0x51   :  { %158 = vrcp.f32 %v108_v34  ;;  %v120_v37 = vand.u32 2147483648, %v108_v34  ;;  %vm114_vm0 = vweird.f32 %v108_v34  ;;  %v118_v39 = vand.u32 2147483647, %v108_v34 }
  0x53   :  { %v121_v41 = vor.u32 1.1754944e-38, %v120_v37  ;;  %vm119_vm3 = vcmp.eq.f32.partialorder %v118_v39, 8.507059e+37 }
  0x57   :  { %v159_v35 = vpop.eup %158 }
  0x58   :  { %v110_v36 = vmul.f32 %v159_v35, %v108_v34  ;;  %vm115_vm1 = vweird.f32 %v159_v35 }
  0x59   :  { %vm116_vm2 = vmor %vm114_vm0, %vm115_vm1 }
  0x5a   :  { %v111_v38 = vsub.f32 1.0, %v110_v36 }
  0x5c   :  { %v112_v40 = vmul.f32 %v159_v35, %v111_v38 }
  0x5e   :  { %v113_v42 = vadd.f32 %v159_v35, %v112_v40 }
  0x60   :  { %v117_v43 = vsel %vm116_vm2, %v159_v35, %v113_v42 }
  0x61   :  { %v122_v44 = vsel %vm119_vm3, %v121_v41, %v117_v43 }
  0x62   :  { %124 = vst [vmem:[#allocation10] sm:$0xff] %v122_v44 }
  0x63   :  { %135 = dma.vmem_to_hbm [thread:$0]  %s131_s3, 128, %s133_s9, [#allocation4]  }
  0x64   :  { %286 = dma.done.wait [#allocation4], 128  }
  0x65   :  { %287 = vsyncadd [#allocation4], 4294967168 }
  0x66   :  { %140 = vsyncpa [#allocation3], 1 }
  0x67   :  { %141 = vsyncpa [#allocation6], 1 }
  0x68   :  { %142 = vsyncpa [#allocation9], 1 }
  0x69   :  { %143 = vsyncpa [#allocation4], 1 }

</bundles_post_ra>
